<compile_context>
chip_gen: v7x
topology: tpu7x:2x2x1
jax: 0.10.0
libtpu: 0.0.40
codegen_flags: <defaults>
</compile_context>

<pallas_src>
import math
from functools import partial

import numpy as np
import jax
import jax.numpy as jnp
from jax.experimental import pallas as pl
from jax.experimental.pallas import tpu as pltpu


# ---------------------------------------------------------------------------
# sincos positional-embedding construction (numpy glue, matches the PyTorch spec)
# ---------------------------------------------------------------------------
def get_1d_sincos_pos_embed_from_grid(embed_dim, pos):
    if embed_dim % 2 != 0:
        raise ValueError("embed_dim must be divisible by 2")
    omega = np.arange(embed_dim // 2, dtype=np.float64)
    omega /= embed_dim / 2.0
    omega = 1.0 / 10000 ** omega
    pos = pos.reshape(-1)
    out = np.einsum("m,d->md", pos, omega)
    emb_sin = np.sin(out)
    emb_cos = np.cos(out)
    return np.concatenate([emb_sin, emb_cos], axis=1)


def get_2d_sincos_pos_embed_from_grid(embed_dim, grid):
    if embed_dim % 2 != 0:
        raise ValueError("embed_dim must be divisible by 2")
    emb_h = get_1d_sincos_pos_embed_from_grid(embed_dim // 2, grid[0])
    emb_w = get_1d_sincos_pos_embed_from_grid(embed_dim // 2, grid[1])
    return np.concatenate([emb_h, emb_w], axis=1)


def get_3d_sincos_pos_embed_factors(embed_dim, spatial_size, temporal_size,
                                    spatial_interpolation_scale=1.0,
                                    temporal_interpolation_scale=1.0):
    """Factored 3D sincos PE:
         pe_temporal : (T, embed_dim // 4)
         pe_spatial  : (L, 3 * embed_dim // 4), L = H * W patches
       The dense PE is concat([pe_temporal[t], pe_spatial[l]]) along -1."""
    if embed_dim % 4 != 0:
        raise ValueError("`embed_dim` must be divisible by 4")
    if isinstance(spatial_size, int):
        spatial_size = (spatial_size, spatial_size)
    embed_dim_spatial = 3 * embed_dim // 4
    embed_dim_temporal = embed_dim // 4
    grid_h = np.arange(spatial_size[1], dtype=np.float32) / spatial_interpolation_scale
    grid_w = np.arange(spatial_size[0], dtype=np.float32) / spatial_interpolation_scale
    grid = np.meshgrid(grid_w, grid_h)
    grid = np.stack(grid, axis=0)
    grid = grid.reshape([2, 1, spatial_size[1], spatial_size[0]])
    pos_embed_spatial = get_2d_sincos_pos_embed_from_grid(embed_dim_spatial, grid)
    grid_t = np.arange(temporal_size, dtype=np.float32) / temporal_interpolation_scale
    pos_embed_temporal = get_1d_sincos_pos_embed_from_grid(embed_dim_temporal, grid_t)
    return pos_embed_temporal, pos_embed_spatial


def get_3d_sincos_pos_embed(embed_dim, spatial_size, temporal_size,
                            spatial_interpolation_scale=1.0,
                            temporal_interpolation_scale=1.0):
    """Dense (T, L, D) PE — used only by the reference check."""
    pe_t, pe_s = get_3d_sincos_pos_embed_factors(
        embed_dim, spatial_size, temporal_size,
        spatial_interpolation_scale, temporal_interpolation_scale)
    T, L = pe_t.shape[0], pe_s.shape[0]
    pe_s = np.repeat(pe_s[np.newaxis, :, :], T, axis=0)
    pe_t = np.repeat(pe_t[:, np.newaxis, :], L, axis=1)
    return np.concatenate([pe_t, pe_s], axis=-1)


# ---------------------------------------------------------------------------
# Pallas kernel: (frame-block, L-tile) patch-matmul + factored sincos-PE add
# ---------------------------------------------------------------------------
def _patch_embed_kernel(x_ref, w_ref, pe_s_ref, pe_t_ref, o_ref):
    # x_ref   : (tBF, tL, K)  patch rows for tBF frames of one L-tile [in dtype]
    # w_ref   : (K, D)        flattened conv weight (VMEM-resident)   [in dtype]
    # pe_s_ref: (tL, D)       spatial sincos PE (temporal cols zero)  [f32]
    # pe_t_ref: (tBF, 1, D)   temporal sincos PE + conv bias          [f32]
    # o_ref   : (tBF, tL, D)
    w = w_ref[...]                               # hoisted: loaded once per step
    pe_s = pe_s_ref[...]
    t_bf = x_ref.shape[0]
    for f in range(t_bf):                        # static unroll, t_bf is tiny
        acc = jnp.dot(x_ref[f], w, preferred_element_type=jnp.float32)
        o_ref[f] = (acc + pe_s + pe_t_ref[f]).astype(o_ref.dtype)


def _pick_tiles(L, F, K, D, in_itemsize, out_itemsize,
                vmem_budget=24 * 1024 * 1024, max_rows=1024, max_step_rows=4096):
    """Jointly pick (t_bf, t_l): t_l = largest multiple-of-8 divisor of L that
    keeps the double-buffered working set inside a conservative VMEM budget
    (v7x-safe with the default scoped limit); then grow t_bf (a divisor of F)
    to amortize per-grid-step overhead while still fitting the budget."""

    def buf_bytes(t_bf, t_l):
        return (2 * t_bf * t_l * D * out_itemsize      # out  (double-buffered)
                + 2 * t_bf * t_l * K * in_itemsize     # x    (double-buffered)
                + 2 * t_l * D * 4                      # spatial PE (f32)
                + 2 * K * D * in_itemsize              # weight
                + 2 * t_bf * D * 4)                    # temporal PE + bias

    cand = [t for t in range(8, min(L, max_rows) + 1, 8) if L % t == 0]
    if not cand:
        t_l = L                       # no 8-aligned divisor: full-frame block
    else:
        t_l = cand[0]
        for t in cand:                # ascending: ends on the largest that fits
            if buf_bytes(1, t) <= vmem_budget:
                t_l = t
    t_bf = 1
    for t in (2, 4, 8):
        if F % t == 0 and t * t_l <= max_step_rows and buf_bytes(t, t_l) <= vmem_budget:
            t_bf = t
    return t_bf, t_l


@partial(jax.jit, static_argnames=("patch_size", "tile_l", "tile_bf"))
def patch_embed_2d_3d_sincos_pe(latent, conv_w, conv_b, pe_temporal, pe_spatial,
                                *, patch_size, tile_l=None, tile_bf=None):
    """Forward of PatchEmbed2D_3DsincosPE (layer_norm=False, flatten=True).

    latent      : (B, F, C, H, W) float (compute stays in this dtype)
    conv_w      : (D, C, p, p);  conv_b : (D,)
    pe_temporal : (F, D//4)      factored temporal sincos PE
    pe_spatial  : (L, 3*D//4)    factored spatial sincos PE, L = (H//p)*(W//p)
    returns     : (B*F, L, D) in latent.dtype
    """
    B, F, C, H, W = latent.shape
    p = patch_size
    Hp, Wp = H // p, W // p
    L = Hp * Wp
    D = conv_w.shape[0]
    K = C * p * p
    Dt = D // 4

    compute_dtype = latent.dtype
    out_dtype = latent.dtype

    # --- patchify: (B,F,C,H,W) -> (B*F, L, K), k ordered (c, ph, pw) ---------
    # TODO(synk): this transpose materializes one extra copy of the patch tensor
    # in HBM; an in-kernel strided patchify would remove it (minor: K << D).
    x = latent.reshape(B * F, C, Hp, p, Wp, p)
    x = jnp.transpose(x, (0, 2, 4, 1, 3, 5)).reshape(B * F, L, K)
    x = x.astype(compute_dtype)

    w = conv_w.reshape(D, K).T.astype(compute_dtype)                 # (K, D)

    # --- factored pos-embed with conv bias folded in (f32) -------------------
    pe_s = jnp.concatenate(
        [jnp.zeros((L, Dt), jnp.float32), pe_spatial.astype(jnp.float32)], axis=1
    )                                                                # (L, D)
    pe_t = jnp.concatenate(
        [pe_temporal.astype(jnp.float32), jnp.zeros((F, D - Dt), jnp.float32)],
        axis=1,
    ) + conv_b.astype(jnp.float32)[None, :]                          # (F, D)
    pe_t = pe_t.reshape(F, 1, D)

    auto_bf, auto_l = _pick_tiles(L, F, K, D,
                                  jnp.dtype(compute_dtype).itemsize,
                                  jnp.dtype(out_dtype).itemsize)
    t_l = auto_l if tile_l is None else tile_l
    t_bf = auto_bf if tile_bf is None else tile_bf
    if L % t_l != 0 or F % t_bf != 0:
        raise ValueError("tile_l must divide L and tile_bf must divide F")
    n_lt = L // t_l
    n_bf = (B * F) // t_bf
    n_fg = F // t_bf          # frame-groups per batch, for temporal-PE indexing

    out = pl.pallas_call(
        _patch_embed_kernel,
        out_shape=jax.ShapeDtypeStruct((B * F, L, D), out_dtype),
        grid_spec=pltpu.PrefetchScalarGridSpec(
            num_scalar_prefetch=0,
            # frame-groups innermost: the spatial-PE tile's block index is
            # constant across the inner loop (no re-DMA) and the (K, D) weight
            # is fetched once total; only x / out / the tiny pe_t rows stream.
            grid=(n_lt, n_bf),
            in_specs=[
                pl.BlockSpec((t_bf, t_l, K), lambda lt, bfb: (bfb, lt, 0)),
                pl.BlockSpec((K, D), lambda lt, bfb: (0, 0)),
                pl.BlockSpec((t_l, D), lambda lt, bfb: (lt, 0)),
                pl.BlockSpec((t_bf, 1, D), lambda lt, bfb: (bfb % n_fg, 0, 0)),
            ],
            out_specs=pl.BlockSpec((t_bf, t_l, D), lambda lt, bfb: (bfb, lt, 0)),
        ),
        compiler_params=pltpu.CompilerParams(
            dimension_semantics=("parallel", "parallel"),
        ),
    )(x, w, pe_s, pe_t)
    return out
    # TODO(synk): layer_norm=True branch (LayerNorm without affine) not implemented;
    # the module's default is layer_norm=False (norm is None).


# ---------------------------------------------------------------------------
# Pure-JAX reference (mirrors the PyTorch forward) for a correctness check
# ---------------------------------------------------------------------------
def _reference(latent, conv_w, conv_b, pos_embed, patch_size):
    B, F, C, H, W = latent.shape
    p = patch_size
    Hp, Wp = H // p, W // p
    D = conv_w.shape[0]
    x = latent.reshape(B * F, C, H, W)
    y = jax.lax.conv_general_dilated(
        x.astype(jnp.float32), conv_w.astype(jnp.float32),
        window_strides=(p, p), padding="VALID",
        dimension_numbers=("NCHW", "OIHW", "NCHW"),
    ) + conv_b.reshape(1, D, 1, 1).astype(jnp.float32)
    y = y.reshape(B * F, D, Hp * Wp).transpose(0, 2, 1)              # (BF, L, D)
    y = y.reshape(B, F, Hp * Wp, D) + pos_embed[None].astype(jnp.float32)
    return y.reshape(B * F, Hp * Wp, D).astype(latent.dtype)


if __name__ == "__main__":
    # small shapes consistent with the module: B=2, F=4, C=4, H=W=16, p=2, D=32
    B, F, C, H, W = 2, 4, 4, 16, 16
    patch_size = 2
    embed_dim = 32                       # divisible by 4
    Hp, Wp = H // patch_size, W // patch_size
    L = Hp * Wp

    key = jax.random.PRNGKey(0)
    k_lat, k_w, k_b = jax.random.split(key, 3)
    latent = jax.random.normal(k_lat, (B, F, C, H, W), dtype=jnp.float32)
    conv_w = jax.random.normal(k_w, (embed_dim, C, patch_size, patch_size),
                               dtype=jnp.float32) * 0.02
    conv_b = jax.random.normal(k_b, (embed_dim,), dtype=jnp.float32) * 0.02

    pe_t_np, pe_s_np = get_3d_sincos_pos_embed_factors(
        embed_dim, spatial_size=(Hp, Wp), temporal_size=F,
        spatial_interpolation_scale=1.0, temporal_interpolation_scale=1.0)
    pe_temporal = jnp.asarray(pe_t_np.astype(np.float32))            # (F, D/4)
    pe_spatial = jnp.asarray(pe_s_np.astype(np.float32))             # (L, 3D/4)

    pos_embed_dense = jnp.asarray(get_3d_sincos_pos_embed(
        embed_dim, (Hp, Wp), F, 1.0, 1.0).astype(np.float32))        # (F, L, D)
    ref = _reference(latent, conv_w, conv_b, pos_embed_dense, patch_size)

    # f32 run (auto tiles) + tight correctness check against the conv reference
    out = patch_embed_2d_3d_sincos_pe(latent, conv_w, conv_b,
                                      pe_temporal, pe_spatial,
                                      patch_size=patch_size)
    out = jax.block_until_ready(out)
    np.testing.assert_allclose(np.asarray(out), np.asarray(ref),
                               atol=1e-4, rtol=1e-4)

    # explicit small tiles: exercises multi-tile L and >1 frame-group per batch
    out_tiled = patch_embed_2d_3d_sincos_pe(latent, conv_w, conv_b,
                                            pe_temporal, pe_spatial,
                                            patch_size=patch_size,
                                            tile_l=32, tile_bf=2)
    out_tiled = jax.block_until_ready(out_tiled)
    np.testing.assert_allclose(np.asarray(out_tiled), np.asarray(ref),
                               atol=1e-4, rtol=1e-4)

    # bf16 path (the memory-bound win on real shapes): same kernel, loose check
    out_bf16 = patch_embed_2d_3d_sincos_pe(
        latent.astype(jnp.bfloat16), conv_w.astype(jnp.bfloat16), conv_b,
        pe_temporal, pe_spatial, patch_size=patch_size)
    out_bf16 = jax.block_until_ready(out_bf16)
    np.testing.assert_allclose(np.asarray(out_bf16.astype(jnp.float32)),
                               np.asarray(ref), atol=5e-2, rtol=5e-2)

    print("KERNEL_OK")
</pallas_src>

<mosaic_0001>
module attributes {stable_mosaic.version = 11 : i64} {
  func.func @_patch_embed_kernel(%arg0: i32, %arg1: i32, %arg2: memref<4x64x16xf32, #tpu.memory_space<vmem>>, %arg3: memref<16x32xf32, #tpu.memory_space<vmem>>, %arg4: memref<64x32xf32, #tpu.memory_space<vmem>>, %arg5: memref<4x1x32xf32, #tpu.memory_space<vmem>>, %arg6: memref<4x64x32xf32, #tpu.memory_space<vmem>>) attributes {dimension_semantics = [#tpu.dimension_semantics<parallel>, #tpu.dimension_semantics<parallel>], iteration_bounds = array<i64: 1, 2>, scalar_prefetch = 0 : i64, scratch_operands = 0 : i64, tpu.core_type = #tpu.core_type<tc>, window_params = [{transform_indices = @transform_0, window_bounds = array<i64: 4, 64, 16>}, {pipeline_mode = #tpu.pipeline_mode<synchronous>, transform_indices = @transform_1, window_bounds = array<i64: 16, 32>}, {transform_indices = @transform_2, window_bounds = array<i64: 64, 32>}, {transform_indices = @transform_3, window_bounds = array<i64: 4, 1, 32>}, {transform_indices = @transform_4, window_bounds = array<i64: 4, 64, 32>}]} {
    %c0 = arith.constant 0 : index
    %c0_0 = arith.constant 0 : index
    %0 = vector.load %arg3[%c0, %c0_0] : memref<16x32xf32, #tpu.memory_space<vmem>>, vector<16x32xf32>
    %c0_1 = arith.constant 0 : index
    %c0_2 = arith.constant 0 : index
    %1 = vector.load %arg4[%c0_1, %c0_2] : memref<64x32xf32, #tpu.memory_space<vmem>>, vector<64x32xf32>
    %c0_3 = arith.constant 0 : index
    %c0_4 = arith.constant 0 : index
    %c0_5 = arith.constant 0 : index
    %2 = vector.load %arg2[%c0_3, %c0_4, %c0_5] : memref<4x64x16xf32, #tpu.memory_space<vmem>>, vector<1x64x16xf32>
    %3 = vector.shape_cast %2 : vector<1x64x16xf32> to vector<64x16xf32>
    %cst = arith.constant dense<0.000000e+00> : vector<64x32xf32>
    %4 = tpu.matmul %3, %0, %cst {dimension_numbers = #tpu.dot_dimension_numbers<[1], [0], [0], [1], [0, 0, 1, 1], [], []>} : vector<64x16xf32>, vector<16x32xf32>, vector<64x32xf32> -> vector<64x32xf32>
    %5 = arith.addf %4, %1 : vector<64x32xf32>
    %c0_6 = arith.constant 0 : index
    %c0_7 = arith.constant 0 : index
    %c0_8 = arith.constant 0 : index
    %6 = vector.load %arg5[%c0_6, %c0_7, %c0_8] : memref<4x1x32xf32, #tpu.memory_space<vmem>>, vector<1x1x32xf32>
    %7 = vector.shape_cast %6 : vector<1x1x32xf32> to vector<1x32xf32>
    %8 = vector.broadcast %7 : vector<1x32xf32> to vector<64x32xf32>
    %9 = arith.addf %5, %8 : vector<64x32xf32>
    %c0_9 = arith.constant 0 : index
    %c0_10 = arith.constant 0 : index
    %c0_11 = arith.constant 0 : index
    %10 = vector.load %arg6[%c0_9, %c0_10, %c0_11] : memref<4x64x32xf32, #tpu.memory_space<vmem>>, vector<1x64x32xf32>
    %11 = vector.shape_cast %10 : vector<1x64x32xf32> to vector<64x32xf32>
    %12 = vector.shape_cast %9 : vector<64x32xf32> to vector<1x64x32xf32>
    tpu.vector_store %arg6[%c0_9, %c0_10, %c0_11], %12 {strides = array<i32>} : memref<4x64x32xf32, #tpu.memory_space<vmem>>, vector<1x64x32xf32>,
    %c1 = arith.constant 1 : index
    %c0_12 = arith.constant 0 : index
    %c0_13 = arith.constant 0 : index
    %13 = vector.load %arg2[%c1, %c0_12, %c0_13] : memref<4x64x16xf32, #tpu.memory_space<vmem>>, vector<1x64x16xf32>
    %14 = vector.shape_cast %13 : vector<1x64x16xf32> to vector<64x16xf32>
    %cst_14 = arith.constant dense<0.000000e+00> : vector<64x32xf32>
    %15 = tpu.matmul %14, %0, %cst_14 {dimension_numbers = #tpu.dot_dimension_numbers<[1], [0], [0], [1], [0, 0, 1, 1], [], []>} : vector<64x16xf32>, vector<16x32xf32>, vector<64x32xf32> -> vector<64x32xf32>
    %16 = arith.addf %15, %1 : vector<64x32xf32>
    %c1_15 = arith.constant 1 : index
    %c0_16 = arith.constant 0 : index
    %c0_17 = arith.constant 0 : index
    %17 = vector.load %arg5[%c1_15, %c0_16, %c0_17] : memref<4x1x32xf32, #tpu.memory_space<vmem>>, vector<1x1x32xf32>
    %18 = vector.shape_cast %17 : vector<1x1x32xf32> to vector<1x32xf32>
    %19 = vector.broadcast %18 : vector<1x32xf32> to vector<64x32xf32>
    %20 = arith.addf %16, %19 : vector<64x32xf32>
    %c1_18 = arith.constant 1 : index
    %c0_19 = arith.constant 0 : index
    %c0_20 = arith.constant 0 : index
    %21 = vector.load %arg6[%c1_18, %c0_19, %c0_20] : memref<4x64x32xf32, #tpu.memory_space<vmem>>, vector<1x64x32xf32>
    %22 = vector.shape_cast %21 : vector<1x64x32xf32> to vector<64x32xf32>
    %23 = vector.shape_cast %20 : vector<64x32xf32> to vector<1x64x32xf32>
    tpu.vector_store %arg6[%c1_18, %c0_19, %c0_20], %23 {strides = array<i32>} : memref<4x64x32xf32, #tpu.memory_space<vmem>>, vector<1x64x32xf32>,
    %c2 = arith.constant 2 : index
    %c0_21 = arith.constant 0 : index
    %c0_22 = arith.constant 0 : index
    %24 = vector.load %arg2[%c2, %c0_21, %c0_22] : memref<4x64x16xf32, #tpu.memory_space<vmem>>, vector<1x64x16xf32>
    %25 = vector.shape_cast %24 : vector<1x64x16xf32> to vector<64x16xf32>
    %cst_23 = arith.constant dense<0.000000e+00> : vector<64x32xf32>
    %26 = tpu.matmul %25, %0, %cst_23 {dimension_numbers = #tpu.dot_dimension_numbers<[1], [0], [0], [1], [0, 0, 1, 1], [], []>} : vector<64x16xf32>, vector<16x32xf32>, vector<64x32xf32> -> vector<64x32xf32>
    %27 = arith.addf %26, %1 : vector<64x32xf32>
    %c2_24 = arith.constant 2 : index
    %c0_25 = arith.constant 0 : index
    %c0_26 = arith.constant 0 : index
    %28 = vector.load %arg5[%c2_24, %c0_25, %c0_26] : memref<4x1x32xf32, #tpu.memory_space<vmem>>, vector<1x1x32xf32>
    %29 = vector.shape_cast %28 : vector<1x1x32xf32> to vector<1x32xf32>
    %30 = vector.broadcast %29 : vector<1x32xf32> to vector<64x32xf32>
    %31 = arith.addf %27, %30 : vector<64x32xf32>
    %c2_27 = arith.constant 2 : index
    %c0_28 = arith.constant 0 : index
    %c0_29 = arith.constant 0 : index
    %32 = vector.load %arg6[%c2_27, %c0_28, %c0_29] : memref<4x64x32xf32, #tpu.memory_space<vmem>>, vector<1x64x32xf32>
    %33 = vector.shape_cast %32 : vector<1x64x32xf32> to vector<64x32xf32>
    %34 = vector.shape_cast %31 : vector<64x32xf32> to vector<1x64x32xf32>
    tpu.vector_store %arg6[%c2_27, %c0_28, %c0_29], %34 {strides = array<i32>} : memref<4x64x32xf32, #tpu.memory_space<vmem>>, vector<1x64x32xf32>,
    %c3 = arith.constant 3 : index
    %c0_30 = arith.constant 0 : index
    %c0_31 = arith.constant 0 : index
    %35 = vector.load %arg2[%c3, %c0_30, %c0_31] : memref<4x64x16xf32, #tpu.memory_space<vmem>>, vector<1x64x16xf32>
    %36 = vector.shape_cast %35 : vector<1x64x16xf32> to vector<64x16xf32>
    %cst_32 = arith.constant dense<0.000000e+00> : vector<64x32xf32>
    %37 = tpu.matmul %36, %0, %cst_32 {dimension_numbers = #tpu.dot_dimension_numbers<[1], [0], [0], [1], [0, 0, 1, 1], [], []>} : vector<64x16xf32>, vector<16x32xf32>, vector<64x32xf32> -> vector<64x32xf32>
    %38 = arith.addf %37, %1 : vector<64x32xf32>
    %c3_33 = arith.constant 3 : index
    %c0_34 = arith.constant 0 : index
    %c0_35 = arith.constant 0 : index
    %39 = vector.load %arg5[%c3_33, %c0_34, %c0_35] : memref<4x1x32xf32, #tpu.memory_space<vmem>>, vector<1x1x32xf32>
    %40 = vector.shape_cast %39 : vector<1x1x32xf32> to vector<1x32xf32>
    %41 = vector.broadcast %40 : vector<1x32xf32> to vector<64x32xf32>
    %42 = arith.addf %38, %41 : vector<64x32xf32>
    %c3_36 = arith.constant 3 : index
    %c0_37 = arith.constant 0 : index
    %c0_38 = arith.constant 0 : index
    %43 = vector.load %arg6[%c3_36, %c0_37, %c0_38] : memref<4x64x32xf32, #tpu.memory_space<vmem>>, vector<1x64x32xf32>
    %44 = vector.shape_cast %43 : vector<1x64x32xf32> to vector<64x32xf32>
    %45 = vector.shape_cast %42 : vector<64x32xf32> to vector<1x64x32xf32>
    tpu.vector_store %arg6[%c3_36, %c0_37, %c0_38], %45 {strides = array<i32>} : memref<4x64x32xf32, #tpu.memory_space<vmem>>, vector<1x64x32xf32>,
    return
  }
  func.func @transform_0(%arg0: i32, %arg1: i32) -> (i32, i32, i32) {
    %c0_i32 = arith.constant 0 : i32
    %c0_i32_0 = arith.constant 0 : i32
    return %arg1, %arg0, %c0_i32 : i32, i32, i32
  }
  func.func @transform_1(%arg0: i32, %arg1: i32) -> (i32, i32) {
    %c0_i32 = arith.constant 0 : i32
    %c0_i32_0 = arith.constant 0 : i32
    %c0_i32_1 = arith.constant 0 : i32
    return %c0_i32, %c0_i32_0 : i32, i32
  }
  func.func @transform_2(%arg0: i32, %arg1: i32) -> (i32, i32) {
    %c0_i32 = arith.constant 0 : i32
    %c0_i32_0 = arith.constant 0 : i32
    return %arg0, %c0_i32 : i32, i32
  }
  func.func @transform_3(%arg0: i32, %arg1: i32) -> (i32, i32, i32) {
    %c1_i32 = arith.constant 1 : i32
    %c0_i32 = arith.constant 0 : i32
    %0 = arith.cmpi eq, %c1_i32, %c0_i32 : i32
    %c1_i32_0 = arith.constant 1 : i32
    %1 = arith.select %0, %c1_i32_0, %c1_i32 : i32
    %2 = arith.remsi %arg1, %1 : i32
    %c0_i32_1 = arith.constant 0 : i32
    %3 = arith.cmpi ne, %2, %c0_i32_1 : i32
    %c0_i32_2 = arith.constant 0 : i32
    %4 = arith.cmpi slt, %2, %c0_i32_2 : i32
    %c0_i32_3 = arith.constant 0 : i32
    %5 = arith.cmpi slt, %1, %c0_i32_3 : i32
    %6 = arith.xori %4, %5 : i1
    %7 = arith.andi %6, %3 : i1
    %8 = arith.addi %2, %1 : i32
    %9 = arith.select %7, %8, %2 : i32
    %c0_i32_4 = arith.constant 0 : i32
    %c0_i32_5 = arith.constant 0 : i32
    %c0_i32_6 = arith.constant 0 : i32
    return %9, %c0_i32_4, %c0_i32_5 : i32, i32, i32
  }
  func.func @transform_4(%arg0: i32, %arg1: i32) -> (i32, i32, i32) {
    %c0_i32 = arith.constant 0 : i32
    %c0_i32_0 = arith.constant 0 : i32
    return %arg1, %arg0, %c0_i32 : i32, i32, i32
  }
}

</mosaic_0001>

<bundles_post_ra>
// kernel: patch_embed_2d_3d_sincos_pe.1
= control target key start
LH: loop header
LB: loop body
LE: loop exit
PB: predicated region body
PF: predicated region fallthrough
CT: control target
= control target key end

     0   :  { %s1329_s15 = smov 0   ;;  %s1331_s16 = smov 0   ;;  %s1621_s0 = inlined_call_operand.vmem [shape: f32[8,64,16], index: 0, kind: input, shape index: {}]   ;;  %s1622_s1 = inlined_call_operand.vmem [shape: f32[16,32], index: 1, kind: input, shape index: {}]   ;;  %s1623_s2 = inlined_call_operand.vmem [shape: f32[64,32], index: 2, kind: input, shape index: {}]   ;;  %s1624_s3 = inlined_call_operand.vmem [shape: f32[4,1,32], index: 3, kind: input, shape index: {}]   ;;  %s1625_s4 = inlined_call_operand.vmem [shape: f32[8,64,32], index: 4, kind: output, shape index: {}]  }
   0x1   :  { %s1333_s17 = smov 0  }
   0x2 LB: > { %s23_s18 = sadd.s32 1, %s1298_s16  ;;  %p1038_p0 = scmp.ge.s32.totalorder %s1302_s17, 1  ;;  %s1302_s17 = sphi %s1333_s17, %s14_s17   ;;  %s1298_s16 = sphi %s1331_s16, %s1627_s16   ;;  %s1294_s15 = sphi %s1329_s15, %s1626_s15  }
   0x3   : > { %p24_p1 = scmp.ge.s32.totalorder %s23_s18, 2  ;;  %p196_p2 = scmp.lt.s32.totalorder %s1302_s17, 3 }
   0x5   : > { %s1629_s18 = smov (%p24_p1, %s23_s18), 0  ;;  %p197_p3 = pnand %p1038_p0, %p196_p2 }
   0x6   : > { %v267_v0 = vld [vmem:[%s1622_s1] sm:$0xff] (!%p197_p3)  ;;  %v268_v1 = vld [vmem:[%s1622_s1 + $0x8] sm:$0xff] (!%p197_p3)  ;;  %s1039_s23 = sshll.u32 (!%p197_p3), %s1294_s15, 2  ;;  %vm285_vm0 = vcmask (!%p197_p3), 130048   ;;  %vm430_vm1 = vcmask (!%p197_p3), 261120   ;;  %v1461_v47 = vld [vmem:[%s1623_s2 + $0x18] sm:$0xff] (!%p197_p3) }
   0x7   : > { %200 = sbr.rel (%p197_p3) target bundleno = 266 (0x10a), region = 36  ;;  %v1240_v2 = vpack.c.bf16 (!%p197_p3), %v268_v1, %v267_v0  ;;  %p239_p4 = scmp.lt.s32.totalorder (!%p197_p3), %s1039_s23, 7  ;;  %v1430_v35 = vld [vmem:[%s1623_s2 + $0x8] sm:$0xff] (!%p197_p3)  ;;  %v1435_v36 = vld [vmem:[%s1623_s2] sm:$0xff] (!%p197_p3)  ;;  %v1468_v50 = vld [vmem:[%s1623_s2 + $0x10] sm:$0xff] (!%p197_p3) }
   0x8   : > { %v1440_v38 = vld [vmem:[%s1624_s3] ss:$0 sm:$0xff] (!%p197_p3)  ;;  %v1445_v40 = vld [vmem:[%s1624_s3 + $0x1] ss:$0 sm:$0xff] (!%p197_p3)  ;;  %v1485_v61 = vld [vmem:[%s1623_s2 + $0x28] sm:$0xff] (!%p197_p3) }
   0x9   : > { %1241 = vmatprep.subr.bf16.mxu0 (!%p197_p3), %v1240_v2  ;;  %1245 = vmatprep.subr.bf16.mxu1 (!%p197_p3), %v1240_v2  ;;  %v1494_v0 = vld [vmem:[%s1623_s2 + $0x20] sm:$0xff] (!%p197_p3) }
   0xa   : > { %1243 = vmatpush3.bf16.msra.mxu0 (!%p197_p3), %v1240_v2  ;;  %1247 = vmatpush3.bf16.msra.mxu1 (!%p197_p3), %v1240_v2 }
   0xb   : > { %1249 = vmatprep.subr.bf16.mxu0 (!%p197_p3), %v1240_v2  ;;  %1253 = vmatprep.subr.bf16.mxu1 (!%p197_p3), %v1240_v2 }
   0xe   : > { %s1631_s23 = smov (!%p239_p4, %s1039_s23), 7 }
   0xf   : > { %s1134_s24 = sshll.u32 %s1631_s23, 6 }
  0x10   : > { %s1361_s27 = scalar_lea.vmem %s1621_s0, %s1134_s24  ;;  %s1454_s12 = scalar_lea.vmem %s1625_s4, %s1134_s24 }
  0x11   : > { %v277_v3 = vld [vmem:[%s1361_s27] sm:$0xff]  ;;  %v278_v5 = vld [vmem:[%s1361_s27 + $0x8] sm:$0xff]  ;;  %v279_v7 = vld [vmem:[%s1361_s27 + $0x10] sm:$0xff] }
  0x12   : > { %v1054_v4 = vld [vmem:[%s1361_s27 + $0x40] sm:$0xff]  ;;  %1180 = vmatprep.mubr.msk.f32.mxu0 %vm285_vm0, %v277_v3  ;;  %v1055_v6 = vld [vmem:[%s1361_s27 + $0x48] sm:$0xff]  ;;  %v1056_v8 = vld [vmem:[%s1361_s27 + $0x50] sm:$0xff] }
  0x13   : > { %1196 = vmatprep.mubr.msk.f32.mxu1 %vm285_vm0, %v1054_v4  ;;  %1181 = vmatmul.mubr.msk.f32.vlgmr.msra.gmra.mrb[0].mxu0 %vm285_vm0, %v278_v5  ;;  %v280_v9 = vld [vmem:[%s1361_s27 + $0x18] sm:$0xff]  ;;  %v281_v11 = vld [vmem:[%s1361_s27 + $0x20] sm:$0xff]  ;;  %v282_v13 = vld [vmem:[%s1361_s27 + $0x28] sm:$0xff] }
  0x14   : > { %1197 = vmatmul.mubr.msk.f32.vlgmr.msra.gmra.mrb[0].mxu1 %vm285_vm0, %v1055_v6  ;;  %1251 = vmatpush3.bf16.msra.mxu0 %v1240_v2  ;;  %v1057_v10 = vld [vmem:[%s1361_s27 + $0x58] sm:$0xff]  ;;  %v1058_v12 = vld [vmem:[%s1361_s27 + $0x60] sm:$0xff]  ;;  %v1059_v14 = vld [vmem:[%s1361_s27 + $0x68] sm:$0xff] }
  0x15   : > { %1255 = vmatpush3.bf16.msra.mxu1 %v1240_v2  ;;  %1183 = vmatprep.mubr.msk.f32.mxu0 %vm285_vm0, %v279_v7  ;;  %v283_v15 = vld [vmem:[%s1361_s27 + $0x30] sm:$0xff]  ;;  %v284_v17 = vld [vmem:[%s1361_s27 + $0x38] sm:$0xff]  ;;  %v1080_v19 = vld [vmem:[%s1361_s27 + $0x80] sm:$0xff] }
  0x16   : > { %1199 = vmatprep.mubr.msk.f32.mxu1 %vm285_vm0, %v1056_v8  ;;  %v1060_v16 = vld [vmem:[%s1361_s27 + $0x70] sm:$0xff]  ;;  %v1061_v18 = vld [vmem:[%s1361_s27 + $0x78] sm:$0xff]  ;;  %v1106_v20 = vld [vmem:[%s1361_s27 + $0xc0] sm:$0xff] }
  0x17   : > { %1184 = vmatmul.mubr.msk.f32.gmra.mrb[2].mxu0 %vm285_vm0, %v280_v9  ;;  %v1081_v21 = vld [vmem:[%s1361_s27 + $0x88] sm:$0xff]  ;;  %v1082_v23 = vld [vmem:[%s1361_s27 + $0x90] sm:$0xff]  ;;  %v1083_v25 = vld [vmem:[%s1361_s27 + $0x98] sm:$0xff] }
  0x18   : > { %1200 = vmatmul.mubr.msk.f32.gmra.mrb[2].mxu1 %vm285_vm0, %v1057_v10  ;;  %1186 = vmatprep.mubr.msk.f32.mxu0 %vm285_vm0, %v281_v11  ;;  %v1107_v22 = vld [vmem:[%s1361_s27 + $0xc8] sm:$0xff]  ;;  %v1108_v24 = vld [vmem:[%s1361_s27 + $0xd0] sm:$0xff]  ;;  %v1109_v26 = vld [vmem:[%s1361_s27 + $0xd8] sm:$0xff] }
  0x19   : > { %1202 = vmatprep.mubr.msk.f32.mxu1 %vm285_vm0, %v1058_v12  ;;  %v1084_v27 = vld [vmem:[%s1361_s27 + $0xa0] sm:$0xff]  ;;  %v1085_v29 = vld [vmem:[%s1361_s27 + $0xa8] sm:$0xff]  ;;  %v1086_v31 = vld [vmem:[%s1361_s27 + $0xb0] sm:$0xff] }
  0x1a   : > { %v1110_v28 = vld [vmem:[%s1361_s27 + $0xe0] sm:$0xff]  ;;  %v1111_v30 = vld [vmem:[%s1361_s27 + $0xe8] sm:$0xff]  ;;  %v1112_v32 = vld [vmem:[%s1361_s27 + $0xf0] sm:$0xff] }
  0x1b   : > { %1187 = vmatmul.mubr.msk.f32.gmra.mrb[4].mxu0 %vm285_vm0, %v282_v13  ;;  %v1087_v33 = vld [vmem:[%s1361_s27 + $0xb8] sm:$0xff] }
  0x1c   : > { %1203 = vmatmul.mubr.msk.f32.gmra.mrb[4].mxu1 %vm285_vm0, %v1059_v14  ;;  %1189 = vmatprep.mubr.msk.f32.mxu0 %vm285_vm0, %v283_v15  ;;  %v1113_v34 = vld [vmem:[%s1361_s27 + $0xf8] sm:$0xff]  ;;  %v1520_v14 = vld [vmem:[%s1623_s2 + $0x30] sm:$0xff] }
  0x1d   : > { %1205 = vmatprep.mubr.msk.f32.mxu1 %vm285_vm0, %v1060_v16  ;;  %v1511_v11 = vld [vmem:[%s1623_s2 + $0x38] sm:$0xff] }
  0x1f   : > { %1190 = vmatmul.mubr.msk.f32.gmra.mrb[6].mxu0 %vm285_vm0, %v284_v17 }
  0x20   : > { %1206 = vmatmul.mubr.msk.f32.gmra.mrb[6].mxu1 %vm285_vm0, %v1061_v18  ;;  %1212 = vmatprep.mubr.msk.f32.mxu0 %vm285_vm0, %v1080_v19 }
  0x21   : > { %1228 = vmatprep.mubr.msk.f32.mxu1 %vm285_vm0, %v1106_v20 }
  0x23   : > { %1213 = vmatmul.mubr.msk.f32.vlgmr.msra.gmra.mrb[8].mxu0 %vm285_vm0, %v1081_v21 }
  0x24   : > { %1229 = vmatmul.mubr.msk.f32.vlgmr.msra.gmra.mrb[8].mxu1 %vm285_vm0, %v1107_v22  ;;  %1215 = vmatprep.mubr.msk.f32.mxu0 %vm285_vm0, %v1082_v23 }
  0x25   : > { %1231 = vmatprep.mubr.msk.f32.mxu1 %vm285_vm0, %v1108_v24 }
  0x27   : > { %1216 = vmatmul.mubr.msk.f32.gmra.mrb[10].mxu0 %vm285_vm0, %v1083_v25 }
  0x28   : > { %1232 = vmatmul.mubr.msk.f32.gmra.mrb[10].mxu1 %vm285_vm0, %v1109_v26  ;;  %1218 = vmatprep.mubr.msk.f32.mxu0 %vm285_vm0, %v1084_v27 }
  0x29   : > { %1234 = vmatprep.mubr.msk.f32.mxu1 %vm285_vm0, %v1110_v28 }
  0x2b   : > { %1219 = vmatmul.mubr.msk.f32.gmra.mrb[12].mxu0 %vm285_vm0, %v1085_v29 }
  0x2c   : > { %1235 = vmatmul.mubr.msk.f32.gmra.mrb[12].mxu1 %vm285_vm0, %v1111_v30  ;;  %1221 = vmatprep.mubr.msk.f32.mxu0 %vm285_vm0, %v1086_v31  ;;  %v1543_v30 = vld [vmem:[%s1624_s3 + $0x2] ss:$0 sm:$0xff] }
  0x2d   : > { %1237 = vmatprep.mubr.msk.f32.mxu1 %vm285_vm0, %v1112_v32  ;;  %v1123_v32 = vld [vmem:[%s1624_s3 + $0x3] ss:$0 sm:$0xff] }
  0x2f   : > { %1222 = vmatmul.mubr.msk.f32.gmra.mrb[14].mxu0 %vm285_vm0, %v1087_v33 }
  0x30   : > { %1238 = vmatmul.mubr.msk.f32.gmra.mrb[14].mxu1 %vm285_vm0, %v1113_v34 }
  0xe6   : > { %v1182_v37 = vpop.f32.mrb[0].mxu0 }
  0xe7   : > { %v1198_v39 = vpop.f32.mrb[0].mxu1  ;;  %v382_v41 = vadd.f32 %v1182_v37, %v1430_v35  ;;  %v376_v43 = vpop.f32.mrb[1].mxu0 }
  0xe8   : > { %v544_v42 = vadd.f32 %v1198_v39, %v1430_v35  ;;  %v538_v44 = vpop.f32.mrb[1].mxu1  ;;  %v377_v45 = vadd.f32 %v376_v43, %v1435_v36 }
  0xe9   : > { %v539_v46 = vadd.f32 %v538_v44, %v1435_v36  ;;  %v423_v48 = vadd.f32 %v1440_v38, %v382_v41 }
  0xea   : > { %v586_v49 = vadd.f32 %v1445_v40, %v544_v42  ;;  %v422_v51 = vadd.f32 %v1440_v38, %v377_v45  ;;  %v1185_v53 = vpop.f32.mrb[2].mxu0 }
  0xeb   : > { %v585_v52 = vadd.f32 %v1445_v40, %v539_v46  ;;  %v1201_v54 = vpop.f32.mrb[2].mxu1  ;;  %432 = vst.msk [vmem:[%s1454_s12 + $0x8] sm:$0xff] %vm430_vm1, %v423_v48  ;;  %v392_v55 = vadd.f32 %v1185_v53, %v1461_v47  ;;  %v386_v57 = vpop.f32.mrb[3].mxu0 }
  0xec   : > { %v554_v56 = vadd.f32 %v1201_v54, %v1461_v47  ;;  %v548_v58 = vpop.f32.mrb[3].mxu1  ;;  %1073 = vst.msk [vmem:[%s1454_s12 + $0x48] sm:$0xff] %vm430_vm1, %v586_v49  ;;  %431 = vst.msk [vmem:[%s1454_s12] sm:$0xff] %vm430_vm1, %v422_v51  ;;  %v387_v59 = vadd.f32 %v386_v57, %v1468_v50 }
  0xed   : > { %v549_v60 = vadd.f32 %v548_v58, %v1468_v50  ;;  %1072 = vst.msk [vmem:[%s1454_s12 + $0x40] sm:$0xff] %vm430_vm1, %v585_v52  ;;  %v425_v62 = vadd.f32 %v1440_v38, %v392_v55 }
  0xee   : > { %v588_v63 = vadd.f32 %v1445_v40, %v554_v56  ;;  %v424_v1 = vadd.f32 %v1440_v38, %v387_v59  ;;  %v1188_v3 = vpop.f32.mrb[4].mxu0 }
  0xef   : > { %v587_v2 = vadd.f32 %v1445_v40, %v549_v60  ;;  %v1204_v4 = vpop.f32.mrb[4].mxu1  ;;  %434 = vst.msk [vmem:[%s1454_s12 + $0x18] sm:$0xff] %vm430_vm1, %v425_v62  ;;  %v402_v5 = vadd.f32 %v1188_v3, %v1485_v61  ;;  %v396_v7 = vpop.f32.mrb[5].mxu0 }
  0xf0   : > { %v564_v6 = vadd.f32 %v1204_v4, %v1485_v61  ;;  %v558_v8 = vpop.f32.mrb[5].mxu1  ;;  %1075 = vst.msk [vmem:[%s1454_s12 + $0x58] sm:$0xff] %vm430_vm1, %v588_v63  ;;  %433 = vst.msk [vmem:[%s1454_s12 + $0x10] sm:$0xff] %vm430_vm1, %v424_v1  ;;  %v397_v9 = vadd.f32 %v396_v7, %v1494_v0 }
  0xf1   : > { %v559_v10 = vadd.f32 %v558_v8, %v1494_v0  ;;  %1074 = vst.msk [vmem:[%s1454_s12 + $0x50] sm:$0xff] %vm430_vm1, %v587_v2  ;;  %v427_v12 = vadd.f32 %v1440_v38, %v402_v5 }
  0xf2   : > { %v590_v13 = vadd.f32 %v1445_v40, %v564_v6  ;;  %v426_v15 = vadd.f32 %v1440_v38, %v397_v9  ;;  %v1191_v17 = vpop.f32.mrb[6].mxu0 }
  0xf3   : > { %v589_v16 = vadd.f32 %v1445_v40, %v559_v10  ;;  %v1207_v18 = vpop.f32.mrb[6].mxu1  ;;  %436 = vst.msk [vmem:[%s1454_s12 + $0x28] sm:$0xff] %vm430_vm1, %v427_v12  ;;  %v412_v19 = vadd.f32 %v1191_v17, %v1511_v11  ;;  %v406_v21 = vpop.f32.mrb[7].mxu0 }
  0xf4   : > { %v574_v20 = vadd.f32 %v1207_v18, %v1511_v11  ;;  %v568_v22 = vpop.f32.mrb[7].mxu1  ;;  %1077 = vst.msk [vmem:[%s1454_s12 + $0x68] sm:$0xff] %vm430_vm1, %v590_v13  ;;  %435 = vst.msk [vmem:[%s1454_s12 + $0x20] sm:$0xff] %vm430_vm1, %v426_v15  ;;  %v407_v23 = vadd.f32 %v406_v21, %v1520_v14 }
  0xf5   : > { %v569_v24 = vadd.f32 %v568_v22, %v1520_v14  ;;  %1076 = vst.msk [vmem:[%s1454_s12 + $0x60] sm:$0xff] %vm430_vm1, %v589_v16  ;;  %v429_v25 = vadd.f32 %v1440_v38, %v412_v19 }
  0xf6   : > { %v592_v26 = vadd.f32 %v1445_v40, %v574_v20  ;;  %v428_v27 = vadd.f32 %v1440_v38, %v407_v23  ;;  %v1214_v29 = vpop.f32.mrb[8].mxu0 }
  0xf7   : > { %v591_v28 = vadd.f32 %v1445_v40, %v569_v24  ;;  %v1230_v31 = vpop.f32.mrb[8].mxu1  ;;  %438 = vst.msk [vmem:[%s1454_s12 + $0x38] sm:$0xff] %vm430_vm1, %v429_v25  ;;  %v707_v33 = vadd.f32 %v1214_v29, %v1430_v35  ;;  %v701_v37 = vpop.f32.mrb[9].mxu0 }
  0xf8   : > { %v870_v34 = vadd.f32 %v1230_v31, %v1430_v35  ;;  %v864_v38 = vpop.f32.mrb[9].mxu1  ;;  %1079 = vst.msk [vmem:[%s1454_s12 + $0x78] sm:$0xff] %vm430_vm1, %v592_v26  ;;  %437 = vst.msk [vmem:[%s1454_s12 + $0x30] sm:$0xff] %vm430_vm1, %v428_v27  ;;  %v702_v39 = vadd.f32 %v701_v37, %v1435_v36 }
  0xf9   : > { %v865_v40 = vadd.f32 %v864_v38, %v1435_v36  ;;  %1078 = vst.msk [vmem:[%s1454_s12 + $0x70] sm:$0xff] %vm430_vm1, %v591_v28  ;;  %v749_v41 = vadd.f32 %v1543_v30, %v707_v33 }
  0xfa   : > { %v912_v42 = vadd.f32 %v1123_v32, %v870_v34  ;;  %v748_v35 = vadd.f32 %v1543_v30, %v702_v39  ;;  %v1217_v44 = vpop.f32.mrb[10].mxu0 }
  0xfb   : > { %v911_v43 = vadd.f32 %v1123_v32, %v865_v40  ;;  %v1233_v45 = vpop.f32.mrb[10].mxu1  ;;  %1099 = vst.msk [vmem:[%s1454_s12 + $0x88] sm:$0xff] %vm430_vm1, %v749_v41  ;;  %v717_v46 = vadd.f32 %v1217_v44, %v1461_v47  ;;  %v711_v49 = vpop.f32.mrb[11].mxu0 }
  0xfc   : > { %v880_v48 = vadd.f32 %v1233_v45, %v1461_v47  ;;  %v874_v36 = vpop.f32.mrb[11].mxu1  ;;  %1125 = vst.msk [vmem:[%s1454_s12 + $0xc8] sm:$0xff] %vm430_vm1, %v912_v42  ;;  %1098 = vst.msk [vmem:[%s1454_s12 + $0x80] sm:$0xff] %vm430_vm1, %v748_v35  ;;  %v712_v51 = vadd.f32 %v711_v49, %v1468_v50 }
  0xfd   : > { %v875_v52 = vadd.f32 %v874_v36, %v1468_v50  ;;  %1124 = vst.msk [vmem:[%s1454_s12 + $0xc0] sm:$0xff] %vm430_vm1, %v911_v43  ;;  %v751_v53 = vadd.f32 %v1543_v30, %v717_v46 }
  0xfe   : > { %v914_v54 = vadd.f32 %v1123_v32, %v880_v48  ;;  %v750_v47 = vadd.f32 %v1543_v30, %v712_v51  ;;  %v1220_v56 = vpop.f32.mrb[12].mxu0 }
  0xff   : > { %v913_v55 = vadd.f32 %v1123_v32, %v875_v52  ;;  %v1236_v57 = vpop.f32.mrb[12].mxu1  ;;  %1101 = vst.msk [vmem:[%s1454_s12 + $0x98] sm:$0xff] %vm430_vm1, %v751_v53  ;;  %v727_v58 = vadd.f32 %v1220_v56, %v1485_v61  ;;  %v721_v60 = vpop.f32.mrb[13].mxu0 }
 0x100   : > { %v890_v59 = vadd.f32 %v1236_v57, %v1485_v61  ;;  %v884_v50 = vpop.f32.mrb[13].mxu1  ;;  %1127 = vst.msk [vmem:[%s1454_s12 + $0xd8] sm:$0xff] %vm430_vm1, %v914_v54  ;;  %1100 = vst.msk [vmem:[%s1454_s12 + $0x90] sm:$0xff] %vm430_vm1, %v750_v47  ;;  %v722_v62 = vadd.f32 %v721_v60, %v1494_v0 }
 0x101   : > { %v885_v63 = vadd.f32 %v884_v50, %v1494_v0  ;;  %1126 = vst.msk [vmem:[%s1454_s12 + $0xd0] sm:$0xff] %vm430_vm1, %v913_v55  ;;  %v753_v1 = vadd.f32 %v1543_v30, %v727_v58 }
 0x102   : > { %v916_v2 = vadd.f32 %v1123_v32, %v890_v59  ;;  %v752_v61 = vadd.f32 %v1543_v30, %v722_v62  ;;  %v1223_v4 = vpop.f32.mrb[14].mxu0 }
 0x103   : > { %v915_v3 = vadd.f32 %v1123_v32, %v885_v63  ;;  %v1239_v5 = vpop.f32.mrb[14].mxu1  ;;  %1103 = vst.msk [vmem:[%s1454_s12 + $0xa8] sm:$0xff] %vm430_vm1, %v753_v1  ;;  %v737_v6 = vadd.f32 %v1223_v4, %v1511_v11  ;;  %v731_v7 = vpop.f32.mrb[15].mxu0 }
 0x104   : > { %v900_v0 = vadd.f32 %v1239_v5, %v1511_v11  ;;  %v894_v8 = vpop.f32.mrb[15].mxu1  ;;  %1129 = vst.msk [vmem:[%s1454_s12 + $0xe8] sm:$0xff] %vm430_vm1, %v916_v2  ;;  %1102 = vst.msk [vmem:[%s1454_s12 + $0xa0] sm:$0xff] %vm430_vm1, %v752_v61  ;;  %v732_v9 = vadd.f32 %v731_v7, %v1520_v14 }
 0x105   : > { %v895_v10 = vadd.f32 %v894_v8, %v1520_v14  ;;  %1128 = vst.msk [vmem:[%s1454_s12 + $0xe0] sm:$0xff] %vm430_vm1, %v915_v3  ;;  %v755_v12 = vadd.f32 %v1543_v30, %v737_v6 }
 0x106   : > { %v918_v13 = vadd.f32 %v1123_v32, %v900_v0  ;;  %v754_v15 = vadd.f32 %v1543_v30, %v732_v9 }
 0x107   : > { %v917_v16 = vadd.f32 %v1123_v32, %v895_v10  ;;  %1105 = vst.msk [vmem:[%s1454_s12 + $0xb8] sm:$0xff] %vm430_vm1, %v755_v12 }
 0x108   : > { %1131 = vst.msk [vmem:[%s1454_s12 + $0xf8] sm:$0xff] %vm430_vm1, %v918_v13  ;;  %1104 = vst.msk [vmem:[%s1454_s12 + $0xb0] sm:$0xff] %vm430_vm1, %v754_v15 }
 0x109   : > { %1130 = vst.msk [vmem:[%s1454_s12 + $0xf0] sm:$0xff] %vm430_vm1, %v917_v16 }
 0x10a PF: > { %s14_s17 = sadd.s32 1, %s1302_s17   ;;  %s1626_s15 = smov %s1298_s16 }
 0x10b   : > { %p11_p5 = scmp.ge.s32.totalorder %s14_s17, 4   ;;  %s1627_s16 = smov %s1629_s18 }
 0x10d   :  { %13 = sbr.rel (!%p11_p5) target bundleno = 2 (0x2), region = 78 }

</bundles_post_ra>
